<compile_context>
chip_gen: v7x
topology: tpu7x:2x2x1
jax: 0.10.0
libtpu: 0.0.40
codegen_flags: <defaults>
</compile_context>

<pallas_src>
import functools

import jax
import jax.numpy as jnp
from jax.experimental import pallas as pl
from jax.experimental.pallas import tpu as pltpu


def _round_up(x: int, m: int) -> int:
    return ((x + m - 1) // m) * m


def _pick_tile(dim: int, max_tile: int, align: int):
    """Return (padded_dim, tile) with tile | padded_dim, tile <= max_tile,
    tile % align == 0, while keeping padding overhead small."""
    d = _round_up(dim, align)
    if d <= max_tile:
        return d, d  # single tile along this axis, minimal padding
    best_t, best_pad = align, _round_up(d, align)
    t = max_tile
    while t >= align:
        padded = _round_up(d, t)
        if padded - d <= max(t // 4, align):
            return padded, t  # biggest tile with small (<=25%-of-tile) overhead
        if padded < best_pad:
            best_pad, best_t = padded, t
        t //= 2
    return best_pad, best_t


def linear_kernel(x_ref, w_ref, b_ref, o_ref, acc_ref):
    # x_ref:   (tm, tk)  activation tile, f32 (cast to bf16 for the MXU)
    # w_ref:   (tk, tn)  weight tile, bf16, already [D_in, D_out] layout
    # b_ref:   (1,  tn)  bias tile, f32 (K-invariant -> VMEM-resident)
    # o_ref:   (tm, tn)  output tile, f32
    # acc_ref: (tm, tn)  f32 VMEM accumulator
    k = pl.program_id(2)

    @pl.when(k == 0)
    def _():
        acc_ref[...] = jnp.zeros_like(acc_ref)

    # bf16 x bf16 -> f32 on the MXU; plain [M,K]x[K,N], no in-kernel transpose.
    acc_ref[...] += jnp.dot(
        x_ref[...].astype(w_ref.dtype),
        w_ref[...],
        preferred_element_type=jnp.float32,
    )

    @pl.when(k == pl.num_programs(2) - 1)
    def _():
        # Bias add once, in the finalize branch (off the K inner loop).
        o_ref[...] = (acc_ref[...] + b_ref[...]).astype(o_ref.dtype)


class PallasLinear:
    """Pallas equivalent of torch.nn.Linear(input_size, output_size) forward."""

    def __init__(self, weight, bias, *, tm_max=512, tn_max=512, tk_max=1024,
                 compute_dtype=jnp.bfloat16):
        # weight: (D_out, D_in) f32 (PyTorch layout), bias: (D_out,) f32
        d_out, d_in = weight.shape
        assert bias.shape == (d_out,)
        self.d_in, self.d_out = d_in, d_out
        self.tm_max = tm_max

        # Static tiling of the parameter axes (lane-aligned: 128).
        self.N, self.tn = _pick_tile(d_out, tn_max, 128)
        self.K, self.tk = _pick_tile(d_in, tk_max, 128)

        # One-time parameter prep (amortized to zero per forward call):
        # transpose to [D_in, D_out], cast to bf16, zero-pad to (K, N).
        w_t = jnp.asarray(weight).T.astype(compute_dtype)
        if (self.K, self.N) != (d_in, d_out):
            w_t = jnp.pad(w_t, ((0, self.K - d_in), (0, self.N - d_out)))
        self.w_t = w_t

        b2d = jnp.asarray(bias, dtype=jnp.float32).reshape(1, d_out)
        if self.N != d_out:
            b2d = jnp.pad(b2d, ((0, 0), (0, self.N - d_out)))
        self.b2d = b2d

    def __call__(self, x):
        B, d_in = x.shape
        assert d_in == self.d_in, "x inner dim must match weight inner dim"

        # Batch axis: pad only to a sublane multiple (8), not to the tile size.
        M, tm = _pick_tile(B, self.tm_max, 8)
        N, tn, K, tk = self.N, self.tn, self.K, self.tk

        # v7x has 2 TensorCores: keep >=2 "parallel" output tiles when cheap,
        # so a (1,1,K) grid doesn't idle a core.
        if (M // tm) * (N // tn) == 1:
            if tn >= 256 and (tn // 2) % 128 == 0:
                tn //= 2
            elif tm >= 16 and (tm // 2) % 8 == 0:
                tm //= 2

        x_p = x
        if (M, K) != (B, d_in):
            # Zero K-padding contributes nothing to the dot; padded rows are
            # sliced off below.
            x_p = jnp.pad(x, ((0, M - B), (0, K - d_in)))

        grid = (M // tm, N // tn, K // tk)

        cost = pl.CostEstimate(
            flops=2 * M * N * K,
            transcendentals=0,
            bytes_accessed=(M * K * 4) + (K * N * 2) + (N * 4) + (M * N * 4),
        )

        out = pl.pallas_call(
            linear_kernel,
            out_shape=jax.ShapeDtypeStruct((M, N), jnp.float32),
            grid_spec=pltpu.PrefetchScalarGridSpec(
                num_scalar_prefetch=0,
                grid=grid,
                in_specs=[
                    pl.BlockSpec((tm, tk), lambda i, j, k: (i, k)),   # x
                    # Weight: already [D_in, D_out] bf16; streamed per k step.
                    # TODO(synk): add pipeline_mode=pl.Buffered(3) here if the
                    # profile shows exposed DMA at k-step boundaries.
                    pl.BlockSpec((tk, tn), lambda i, j, k: (k, j)),   # weight
                    pl.BlockSpec((1, tn), lambda i, j, k: (0, j)),    # bias
                ],
                out_specs=pl.BlockSpec((tm, tn), lambda i, j, k: (i, j)),
                scratch_shapes=[pltpu.VMEM((tm, tn), jnp.float32)],
            ),
            compiler_params=pltpu.CompilerParams(
                # M/N parallel -> sharded across v7x's 2 TCs; K sequential for
                # the resident accumulator.
                dimension_semantics=("parallel", "parallel", "arbitrary"),
                # 48 MiB: within v7x's 64 MiB physical VMEM, far above what the
                # double-buffered 512/512/1024 tiles need (~9 MiB), and well
                # past v5e's 16 MiB / v6e's 32 MiB scoped defaults.
                vmem_limit_bytes=48 * 1024 * 1024,
            ),
            cost_estimate=cost,
        )(x_p, self.w_t, self.b2d)

        if (M, N) != (B, self.d_out):
            out = out[:B, :self.d_out]
        return out


if __name__ == "__main__":
    # Small shapes implied by the module: input_size=32, output_size=16, batch=8.
    batch, input_size, output_size = 8, 32, 16

    key = jax.random.PRNGKey(0)
    kx, kw, kb = jax.random.split(key, 3)

    # torch.nn.Linear default init: uniform(-1/sqrt(in), 1/sqrt(in)).
    bound = 1.0 / jnp.sqrt(jnp.float32(input_size))
    weight = jax.random.uniform(kw, (output_size, input_size),
                                dtype=jnp.float32, minval=-bound, maxval=bound)
    bias = jax.random.uniform(kb, (output_size,),
                              dtype=jnp.float32, minval=-bound, maxval=bound)
    x = jax.random.normal(kx, (batch, input_size), dtype=jnp.float32)

    linear = PallasLinear(weight, bias)
    y = jax.block_until_ready(linear(x))
    assert y.shape == (batch, output_size)

    # Reference 1: bf16-operand emulation of the kernel (tight tolerance).
    x_bf = x.astype(jnp.bfloat16).astype(jnp.float32)
    w_bf = weight.astype(jnp.bfloat16).astype(jnp.float32)
    y_ref_bf16 = x_bf @ w_bf.T + bias
    assert jnp.allclose(y, y_ref_bf16, atol=1e-4, rtol=1e-4)

    # Reference 2: pure-f32 PyTorch forward (loose tolerance: bf16 operands).
    y_ref_f32 = x @ weight.T + bias
    assert jnp.allclose(y, y_ref_f32, atol=2e-2, rtol=2e-2)

    print("KERNEL_OK")
</pallas_src>

<mosaic_0001>
module attributes {stable_mosaic.version = 11 : i64} {
  func.func @linear_kernel(%arg0: i32, %arg1: i32, %arg2: i32, %arg3: memref<8x128xf32, #tpu.memory_space<vmem>>, %arg4: memref<128x128xbf16, #tpu.memory_space<vmem>>, %arg5: memref<1x128xf32, #tpu.memory_space<vmem>>, %arg6: memref<8x128xf32, #tpu.memory_space<vmem>>, %arg7: memref<8x128xf32, #tpu.memory_space<vmem>>) attributes {dimension_semantics = [#tpu.dimension_semantics<parallel>, #tpu.dimension_semantics<parallel>, #tpu.dimension_semantics<arbitrary>], iteration_bounds = array<i64: 1, 1, 1>, scalar_prefetch = 0 : i64, scratch_operands = 1 : i64, tpu.core_type = #tpu.core_type<tc>, window_params = [{transform_indices = @transform_0, window_bounds = array<i64: 8, 128>}, {transform_indices = @transform_1, window_bounds = array<i64: 128, 128>}, {transform_indices = @transform_2, window_bounds = array<i64: 1, 128>}, {transform_indices = @transform_3, window_bounds = array<i64: 8, 128>}]} {
    %c0_i32 = arith.constant 0 : i32
    %0 = arith.cmpi eq, %arg2, %c0_i32 : i32
    %1 = arith.extui %0 : i1 to i32
    %c0_i32_0 = arith.constant 0 : i32
    %2 = arith.cmpi ne, %1, %c0_i32_0 : i32
    scf.if %2 {
      %cst_10 = arith.constant 0.000000e+00 : f32
      %13 = vector.broadcast %cst_10 : f32 to vector<8x128xf32>
      %c0_11 = arith.constant 0 : index
      %c0_12 = arith.constant 0 : index
      %14 = vector.load %arg7[%c0_11, %c0_12] : memref<8x128xf32, #tpu.memory_space<vmem>>, vector<8x128xf32>
      tpu.vector_store %arg7[%c0_11, %c0_12], %13 {strides = array<i32>} : memref<8x128xf32, #tpu.memory_space<vmem>>, vector<8x128xf32>,
    } else {
    }
    %c0 = arith.constant 0 : index
    %c0_1 = arith.constant 0 : index
    %3 = vector.load %arg7[%c0, %c0_1] : memref<8x128xf32, #tpu.memory_space<vmem>>, vector<8x128xf32>
    %c0_2 = arith.constant 0 : index
    %c0_3 = arith.constant 0 : index
    %4 = vector.load %arg3[%c0_2, %c0_3] : memref<8x128xf32, #tpu.memory_space<vmem>>, vector<8x128xf32>
    %5 = arith.truncf %4 : vector<8x128xf32> to vector<8x128xbf16>
    %c0_4 = arith.constant 0 : index
    %c0_5 = arith.constant 0 : index
    %6 = vector.load %arg4[%c0_4, %c0_5] : memref<128x128xbf16, #tpu.memory_space<vmem>>, vector<128x128xbf16>
    %cst = arith.constant dense<0.000000e+00> : vector<8x128xf32>
    %7 = tpu.matmul %5, %6, %cst {dimension_numbers = #tpu.dot_dimension_numbers<[1], [0], [0], [1], [0, 0, 1, 1], [], []>} : vector<8x128xbf16>, vector<128x128xbf16>, vector<8x128xf32> -> vector<8x128xf32>
    %8 = arith.addf %3, %7 : vector<8x128xf32>
    %c0_6 = arith.constant 0 : index
    %c0_7 = arith.constant 0 : index
    %9 = vector.load %arg7[%c0_6, %c0_7] : memref<8x128xf32, #tpu.memory_space<vmem>>, vector<8x128xf32>
    tpu.vector_store %arg7[%c0_6, %c0_7], %8 {strides = array<i32>} : memref<8x128xf32, #tpu.memory_space<vmem>>, vector<8x128xf32>,
    %c0_i32_8 = arith.constant 0 : i32
    %10 = arith.cmpi eq, %arg2, %c0_i32_8 : i32
    %11 = arith.extui %10 : i1 to i32
    %c0_i32_9 = arith.constant 0 : i32
    %12 = arith.cmpi ne, %11, %c0_i32_9 : i32
    scf.if %12 {
      %c0_10 = arith.constant 0 : index
      %c0_11 = arith.constant 0 : index
      %13 = vector.load %arg7[%c0_10, %c0_11] : memref<8x128xf32, #tpu.memory_space<vmem>>, vector<8x128xf32>
      %c0_12 = arith.constant 0 : index
      %c0_13 = arith.constant 0 : index
      %14 = vector.load %arg5[%c0_12, %c0_13] : memref<1x128xf32, #tpu.memory_space<vmem>>, vector<1x128xf32>
      %15 = vector.broadcast %14 : vector<1x128xf32> to vector<8x128xf32>
      %16 = arith.addf %13, %15 : vector<8x128xf32>
      %c0_14 = arith.constant 0 : index
      %c0_15 = arith.constant 0 : index
      %17 = vector.load %arg6[%c0_14, %c0_15] : memref<8x128xf32, #tpu.memory_space<vmem>>, vector<8x128xf32>
      tpu.vector_store %arg6[%c0_14, %c0_15], %16 {strides = array<i32>} : memref<8x128xf32, #tpu.memory_space<vmem>>, vector<8x128xf32>,
    } else {
    }
    return
  }
  func.func @transform_0(%arg0: i32, %arg1: i32, %arg2: i32) -> (i32, i32) {
    %c0_i32 = arith.constant 0 : i32
    return %arg0, %arg2 : i32, i32
  }
  func.func @transform_1(%arg0: i32, %arg1: i32, %arg2: i32) -> (i32, i32) {
    %c0_i32 = arith.constant 0 : i32
    return %arg2, %arg1 : i32, i32
  }
  func.func @transform_2(%arg0: i32, %arg1: i32, %arg2: i32) -> (i32, i32) {
    %c0_i32 = arith.constant 0 : i32
    %c0_i32_0 = arith.constant 0 : i32
    return %c0_i32, %arg1 : i32, i32
  }
  func.func @transform_3(%arg0: i32, %arg1: i32, %arg2: i32) -> (i32, i32) {
    %c0_i32 = arith.constant 0 : i32
    return %arg0, %arg1 : i32, i32
  }
}

</mosaic_0001>

<bundles_post_ra>
// kernel: tpu_custom_call.1
= control target key start
LH: loop header
LB: loop body
LE: loop exit
PB: predicated region body
PF: predicated region fallthrough
CT: control target
= control target key end

     0   :  { %8 = vsyncpa [#allocation4], 0  ;;  %s383_s0 = inlined_call_operand.hbm [shape: f32[8,128], index: 0, kind: input, shape index: {}]   ;;  %s384_s1 = inlined_call_operand.hbm [shape: bf16[128,128], index: 1, kind: input, shape index: {}]   ;;  %s385_s2 = inlined_call_operand.vmem [shape: f32[1,128], index: 2, kind: input, shape index: {}]   ;;  %s386_s3 = inlined_call_operand.hbm [shape: f32[8,128], index: 3, kind: output, shape index: {}]  }
   0x1   :  { %9 = vsyncpa [#allocation7], 0 }
   0x2   :  { %10 = vsyncpa [#allocation5], 0  ;;  %s310_s12 = smov [#allocation3]   ;;  %s311_s14 = smov [#allocation6]  }
   0x3   :  { %s17_s13 = sshll.u32 %s310_s12, 4  ;;  %s26_s15 = sshll.u32 %s311_s14, 4  ;;  %s18_s13 = int_to_ptr.vmem [resolvable:$true] %s17_s13  ;;  %s337_s15 = int_to_ptr.vmem [resolvable:$true] %s26_s15 }
   0x4   :  { %s238_s18 = scalar_lea.hbm %s383_s0, 128 }
   0x5   :  { %p239_p0 = scmp.ne.s32.totalorder %s383_s0, %s238_s18  ;;  %p242_p1 = scmp.lt.u32.totalorder %s238_s18, %s383_s0 }
   0x7   :  { %p244_p2 = pnand %p242_p1, %p239_p0 }
   0x9   :  { %247 = shalt.err (!%p244_p2)
}
   0xa   :  { %s248_s23 = scalar_lea.vmem %s18_s13, 128  ;;  %p253_p4 = scmp.lt.s32.totalorder %s18_s13, %s18_s13 }
   0xb   :  { %p249_p3 = scmp.ne.s32.totalorder %s18_s13, %s248_s23  ;;  %p254_p5 = scmp.lt.s32.totalorder %s248_s23, %s248_s23 }
   0xd   :  { %p255_p6 = por %p254_p5, %p253_p4 }
   0xf   :  { %p256_p7 = pnand %p255_p6, %p249_p3 }
  0x11   :  { %259 = shalt.err (!%p256_p7)
}
  0x12   :  { %20 = dma.hbm_to_vmem [thread:$0]  %s383_s0, 128, %s18_s13, [#allocation4]  }
  0x13   :  { %s260_s28 = scalar_lea.hbm %s384_s1, 1024 }
  0x14   :  { %p261_p8 = scmp.ne.s32.totalorder %s384_s1, %s260_s28  ;;  %p264_p9 = scmp.lt.u32.totalorder %s260_s28, %s384_s1 }
  0x16   :  { %p266_p10 = pnand %p264_p9, %p261_p8 }
  0x18   :  { %269 = shalt.err (!%p266_p10)
}
  0x19   :  { %s270_s6 = scalar_lea.vmem %s337_s15, 1024  ;;  %p275_p12 = scmp.lt.s32.totalorder %s337_s15, %s337_s15 }
  0x1a   :  { %p271_p11 = scmp.ne.s32.totalorder %s337_s15, %s270_s6  ;;  %p276_p13 = scmp.lt.s32.totalorder %s270_s6, %s270_s6 }
  0x1c   :  { %p277_p0 = por %p276_p13, %p275_p12 }
  0x1e   :  { %p278_p1 = pnand %p277_p0, %p271_p11 }
  0x20   :  { %281 = shalt.err (!%p278_p1)
}
  0x21   :  { %s312_s0 = smov 64   ;;  %s313_s7 = smov 4  }
  0x22   :  { %32 = dma.hbm_to_vmem [thread:$0]  %s384_s1, 1024, %s337_s15, [#allocation7], %s312_s0, %s312_s0, %s313_s7  }
  0x23   :  { %304 = dma.done.wait [#allocation4], 128  }
  0x24   :  { %305 = vsyncadd [#allocation4], 4294967168 }
  0x25   :  { %306 = dma.done.wait [#allocation7], 1024  }
  0x26   :  { %307 = vsyncadd [#allocation7], 4294966272  ;;  %v314_v0 = vmov 0.0   ;;  %vm315_vm0 = vmmov 0   ;;  %v230_v1 = vld [vmem:[#allocation6] sm:$0xff]   ;;  %v231_v2 = vld [vmem:[#allocation6 + $0x8] sm:$0xff]  }
  0x27   :  { %203 = vmatprep.subr.bf16.mxu0 %v314_v0  ;;  %219 = vmatprep.mubr.msk.bf16.mxu0 %vm315_vm0, %v314_v0  ;;  %v232_v3 = vld [vmem:[#allocation6 + $0x10] sm:$0xff]   ;;  %v233_v4 = vld [vmem:[#allocation6 + $0x18] sm:$0xff]   ;;  %v234_v5 = vld [vmem:[#allocation6 + $0x20] sm:$0xff]   ;;  %s316_s11 = smov [#allocation8]  }
  0x28   :  { %204 = vmatpush3.bf16.msra.mxu0 %v230_v1  ;;  %v235_v6 = vld [vmem:[#allocation6 + $0x28] sm:$0xff]   ;;  %v236_v7 = vld [vmem:[#allocation6 + $0x30] sm:$0xff]   ;;  %v237_v8 = vld [vmem:[#allocation6 + $0x38] sm:$0xff]   ;;  %s175_s12 = sshll.u32 %s316_s11, 4  ;;  %s176_s12 = int_to_ptr.vmem [resolvable:$true] %s175_s12 }
  0x29   :  { %205 = vmatprep.subr.bf16.mxu0 %v314_v0  ;;  %v48_v9 = vld [vmem:[#allocation3] sm:$0xff]  ;;  %s282_s13 = scalar_lea.vmem %s176_s12, 128  ;;  %p287_p3 = scmp.lt.s32.totalorder %s176_s12, %s176_s12 }
  0x2a   :  { %v49_v10 = vpack.c.bf16 %v48_v9, %v48_v9  ;;  %v193_v11 = vld [vmem:[%s385_s2] ss:$0 sm:$0xff]  ;;  %p283_p2 = scmp.ne.s32.totalorder %s176_s12, %s282_s13  ;;  %p288_p4 = scmp.lt.s32.totalorder %s282_s13, %s282_s13 }
  0x2c   :  { %206 = vmatpush3.bf16.msra.mxu0 %v231_v2  ;;  %p289_p5 = por %p288_p4, %p287_p3 }
  0x2d   :  { %207 = vmatprep.subr.bf16.mxu0 %v314_v0 }
  0x2e   :  { %p290_p6 = pnand %p289_p5, %p283_p2 }
  0x30   :  { %208 = vmatpush3.bf16.msra.mxu0 %v232_v3 }
  0x31   :  { %209 = vmatprep.subr.bf16.mxu0 %v314_v0 }
  0x34   :  { %210 = vmatpush3.bf16.msra.mxu0 %v233_v4 }
  0x35   :  { %211 = vmatprep.subr.bf16.mxu0 %v314_v0 }
  0x38   :  { %212 = vmatpush3.bf16.msra.mxu0 %v234_v5 }
  0x39   :  { %213 = vmatprep.subr.bf16.mxu0 %v314_v0 }
  0x3c   :  { %214 = vmatpush3.bf16.msra.mxu0 %v235_v6 }
  0x3d   :  { %215 = vmatprep.subr.bf16.mxu0 %v314_v0 }
  0x40   :  { %216 = vmatpush3.bf16.msra.mxu0 %v236_v7 }
  0x41   :  { %217 = vmatprep.subr.bf16.mxu0 %v314_v0 }
  0x44   :  { %218 = vmatpush3.bf16.msra.mxu0 %v237_v8 }
  0x47   :  { %220 = vmatmul.mubr.bf16.vlgmr.msra.gmra.mrb[0].mxu0 %v49_v10 }
 0x11a   :  { %v148_v12 = vpop.f32.mrb[0].mxu0 }
 0x11b   :  { %v167_v13 = vadd.f32 %v193_v11, %v148_v12  ;;  %v221_v14 = vpop.f32.mrb[1].mxu0 }
 0x11c   :  { %v151_v15 = vpop.f32.mrb[2].mxu0 }
 0x11d   :  { %168 = vst [vmem:[#allocation8] sm:$0xff] %v167_v13  ;;  %v222_v16 = vpop.f32.mrb[3].mxu0 }
 0x11e   :  { %293 = shalt.err (!%p290_p6)
}
 0x11f   :  { %s294_s2 = scalar_lea.hbm %s386_s3, 128 }
 0x120   :  { %p295_p7 = scmp.ne.s32.totalorder %s386_s3, %s294_s2  ;;  %p298_p8 = scmp.lt.u32.totalorder %s294_s2, %s386_s3 }
 0x122   :  { %p300_p9 = pnand %p298_p8, %p295_p7 }
 0x124   :  { %303 = shalt.err (!%p300_p9)
}
 0x125   :  { %178 = dma.vmem_to_hbm [thread:$0]  %s176_s12, 128, %s386_s3, [#allocation5]  }
 0x126   :  { %308 = dma.done.wait [#allocation5], 128  }
 0x127   :  { %309 = vsyncadd [#allocation5], 4294967168 }
 0x128   :  { %182 = vsyncpa [#allocation4], 1 }
 0x129   :  { %183 = vsyncpa [#allocation7], 1 }
 0x12a   :  { %184 = vsyncpa [#allocation5], 1 }

</bundles_post_ra>
